<compile_context>
chip_gen: v6e
topology: v6e:2x2x1
jax: 0.10.0
libtpu: 0.0.40
codegen_flags: <defaults>
</compile_context>

<pallas_src>
import numpy as np
import jax
import jax.numpy as jnp
from jax.experimental import pallas as pl
from jax.experimental.pallas import tpu as pltpu


def _dma_copy_kernel(x_hbm_ref, o_hbm_ref, sem):
    # Single HBM->HBM DMA of the whole (batch, feat) view.  No VMEM staging,
    # no per-tile overhead, no (8,128) block constraints.
    cp = pltpu.make_async_copy(x_hbm_ref, o_hbm_ref, sem)
    cp.start()
    cp.wait()


def numpize_pallas(x: jax.Array) -> np.ndarray:
    """Pallas equivalent of Numpize.forward: returns host numpy (batch, -1)."""
    n = x.shape[0]
    feat = int(np.prod(x.shape[1:])) if x.ndim > 1 else 1
    total = n * feat
    itemsize = np.dtype(x.dtype).itemsize

    # Metadata-only for contiguous inputs; gives the kernel a (batch, feat)
    # view so the output buffer already has the final logical shape.
    x2d = jnp.reshape(x, (n, feat))

    out = pl.pallas_call(
        _dma_copy_kernel,
        out_shape=jax.ShapeDtypeStruct((n, feat), x2d.dtype),
        in_specs=[pl.BlockSpec(memory_space=pl.ANY)],   # raw HBM ref, no auto-DMA
        out_specs=pl.BlockSpec(memory_space=pl.ANY),    # raw HBM ref, no auto-DMA
        scratch_shapes=[pltpu.SemaphoreType.DMA],
        cost_estimate=pl.CostEstimate(
            flops=0,
            transcendentals=0,
            bytes_accessed=2 * total * itemsize,        # one read + one write
        ),
    )(x2d)

    # Single D2H sync, matching .cpu().detach().numpy(); reshape is a no-op
    # (out already has shape (n, feat)) but kept for robustness.
    host = np.asarray(jax.device_get(out))
    return host.reshape(n, feat)


if __name__ == "__main__":
    key = jax.random.PRNGKey(0)
    # Small NCHW input consistent with typical conv-style upstream output.
    x = jax.random.normal(key, (2, 4, 16, 16), dtype=jnp.float32)

    ref = np.asarray(x).reshape(x.shape[0], -1)

    result = numpize_pallas(x)
    jax.block_until_ready(result)  # no-op on host numpy; kept per contract

    assert isinstance(result, np.ndarray)
    assert result.shape == (2, 4 * 16 * 16), result.shape
    np.testing.assert_allclose(result, ref, rtol=0, atol=0)

    print("KERNEL_OK")
</pallas_src>

<mosaic_0001>
module attributes {stable_mosaic.version = 11 : i64} {
  func.func @_dma_copy_kernel(%arg0: memref<2x1024xf32, #tpu.memory_space<any>>, %arg1: memref<2x1024xf32, #tpu.memory_space<any>>, %arg2: memref<!tpu.dma_semaphore, #tpu.memory_space<semaphore_mem>>) attributes {dimension_semantics = [], scalar_prefetch = 0 : i64, scratch_operands = 1 : i64, tpu.core_type = #tpu.core_type<tc>} {
    tpu.enqueue_dma source(%arg0 : memref<2x1024xf32, #tpu.memory_space<any>>) target(%arg1 : memref<2x1024xf32, #tpu.memory_space<any>>) target_semaphore(%arg2 : memref<!tpu.dma_semaphore, #tpu.memory_space<semaphore_mem>>)
    tpu.wait_dma2 semaphore(%arg2 : memref<!tpu.dma_semaphore, #tpu.memory_space<semaphore_mem>>) src(%arg0 : memref<2x1024xf32, #tpu.memory_space<any>>) dst(%arg1 : memref<2x1024xf32, #tpu.memory_space<any>>)
    return
  }
}

</mosaic_0001>

<bundles_post_ra>
// kernel: tpu_custom_call.1
= control target key start
LH: loop header
LB: loop body
LE: loop exit
PB: predicated region body
PF: predicated region fallthrough
CT: control target
= control target key end

     0   :  { %s29_s6 = smov [#allocation2]   ;;  %s30_s7 = smov 131072   ;;  %s48_s0 = inlined_call_operand.hbm [shape: f32[2,1024], index: 0, kind: input, shape index: {}]   ;;  %s49_s1 = inlined_call_operand.hbm [shape: f32[2,1024], index: 1, kind: output, shape index: {}]  }
   0x1   :  { %s31_s8 = smov 0  }
   0x2   :  { %12 = dma.general %s48_s0, 256, %s49_s1, %s29_s6, %s30_s7, [#allocation4], %s31_s8, 0  }
   0x3   :  { %27 = dma.done.wait [#allocation2], 256 }
   0x4   :  { %28 = vsyncadd [#allocation2], 4294967040 }
   0x5   :  { %17 = vsyncmov [#allocation2] }
   0x8   :  { %s18_s13 = vpop.sfrf %17 }
   0x9   :  { %p23_p0 = scmp.ne.s32.totalorder %s18_s13, 0 }
   0xb   :  { %22 = shalt.err (%p23_p0)  }

</bundles_post_ra>
